<compile_context>
chip_gen: v7x
topology: tpu7x:2x2x1
jax: 0.10.0
libtpu: 0.0.40
codegen_flags: <defaults>
</compile_context>

<pallas_src>
import jax
import jax.numpy as jnp
from jax.experimental import pallas as pl
from jax.experimental.pallas import tpu as pltpu

_LANES = 128  # TPU vreg lane width


def linear_kernel(w_ref, b_ref, x_ref, o_ref):
    # w_ref, b_ref: SMEM scalars, shape (1,)
    # x_ref, o_ref: (1, Npad) lane-dense VMEM tiles (batch maps to lanes).
    w = w_ref[0]
    b = b_ref[0]
    # Pure VPU elementwise: vector * scalar + scalar.
    o_ref[...] = x_ref[...] * w + b


def simple_model_forward(x, weight, bias):
    """Pallas-backed equivalent of SimpleModel.forward (nn.Linear(1, 1)).

    x:      [N, 1] float32
    weight: [1, 1] float32  (out_features=1, in_features=1)
    bias:   [1]    float32
    returns [N, 1] float32
    """
    n, in_f = x.shape
    out_f, in_f_w = weight.shape
    assert in_f == 1 and out_f == 1 and in_f_w == 1, (
        "SimpleModel uses nn.Linear(1, 1); this kernel is specialized to it.")

    # Lane-dense layout: (N, 1) -> (1, N) is a pure reshape (same row-major
    # data) since in_features == 1. Pad lanes to a multiple of 128 so the
    # kernel's store is a full, unmasked vst. Both are wrapper-side layout
    # plumbing, not compute.
    n_pad = max(_LANES, ((n + _LANES - 1) // _LANES) * _LANES)
    x_lane = x.reshape(1, n)
    if n_pad != n:
        x_lane = jnp.pad(x_lane, ((0, 0), (0, n_pad - n)))

    w_s = weight.reshape(-1).astype(jnp.float32)  # (1,)
    b_s = bias.reshape(-1).astype(jnp.float32)    # (1,)

    y_lane = pl.pallas_call(
        linear_kernel,
        out_shape=jax.ShapeDtypeStruct((1, n_pad), jnp.float32),
        grid_spec=pltpu.PrefetchScalarGridSpec(
            num_scalar_prefetch=0,
            grid=(1,),
            in_specs=[
                # weight / bias: 4-byte scalars -> SMEM, no padded VMEM tiles,
                # no extra vector-load DMAs.
                pl.BlockSpec(memory_space=pltpu.MemorySpace.SMEM),
                pl.BlockSpec(memory_space=pltpu.MemorySpace.SMEM),
                # x as a single lane-dense (1, n_pad) block; last dim is a
                # multiple of 128 so loads/stores are dense and aligned.
                pl.BlockSpec((1, n_pad), lambda i: (0, 0)),
            ],
            out_specs=pl.BlockSpec((1, n_pad), lambda i: (0, 0)),
        ),
        compiler_params=pltpu.CompilerParams(
            dimension_semantics=("arbitrary",),
        ),
        # Advisory: 2 flops/row (mul+add), in + out rows plus two scalars.
        cost_estimate=pl.CostEstimate(
            flops=2 * n_pad,
            transcendentals=0,
            bytes_accessed=4 * (2 * n_pad + 2),
        ),
    )(w_s, b_s, x_lane)

    # Slice off lane padding and go back to nn.Linear's [N, out_features]
    # layout outside the kernel.
    return y_lane[:, :n].reshape(n, out_f)

    # TODO(synk): if N ever grows large (>> 128 * 1024 lanes), tile the lane
    # axis with a "parallel" grid (tile size a multiple of 128) instead of a
    # single full-array block.


if __name__ == "__main__":
    key = jax.random.PRNGKey(0)
    kx, kw, kb = jax.random.split(key, 3)

    # Input matching the module's usage: x of shape [3, 1] (batch=3, features=1).
    x = jax.random.normal(kx, (3, 1), dtype=jnp.float32)

    # Deterministic parameters for nn.Linear(1, 1): weight (1, 1), bias (1,).
    weight = jax.random.normal(kw, (1, 1), dtype=jnp.float32) * 0.5
    bias = jax.random.normal(kb, (1,), dtype=jnp.float32) * 0.1

    y = simple_model_forward(x, weight, bias)
    y = jax.block_until_ready(y)

    # Reference check against plain-JAX nn.Linear semantics.
    y_ref = x @ weight.T + bias
    assert y.shape == (3, 1)
    assert jnp.allclose(y, y_ref, atol=1e-6, rtol=1e-6)

    print("KERNEL_OK")
</pallas_src>

<mosaic_0001>
module attributes {stable_mosaic.version = 11 : i64} {
  func.func @linear_kernel(%arg0: i32, %arg1: memref<1xf32, #tpu.memory_space<smem>>, %arg2: memref<1xf32, #tpu.memory_space<smem>>, %arg3: memref<1x128xf32, #tpu.memory_space<vmem>>, %arg4: memref<1x128xf32, #tpu.memory_space<vmem>>) attributes {dimension_semantics = [#tpu.dimension_semantics<arbitrary>], iteration_bounds = array<i64: 1>, scalar_prefetch = 0 : i64, scratch_operands = 0 : i64, tpu.core_type = #tpu.core_type<tc>, window_params = [{transform_indices = @transform_0, window_bounds = array<i64: 1>}, {transform_indices = @transform_1, window_bounds = array<i64: 1>}, {pipeline_mode = #tpu.pipeline_mode<synchronous>, transform_indices = @transform_2, window_bounds = array<i64: 1, 128>}, {pipeline_mode = #tpu.pipeline_mode<synchronous>, transform_indices = @transform_3, window_bounds = array<i64: 1, 128>}]} {
    %c0 = arith.constant 0 : index
    %0 = memref.load %arg1[%c0] : memref<1xf32, #tpu.memory_space<smem>>
    %c0_0 = arith.constant 0 : index
    %1 = memref.load %arg2[%c0_0] : memref<1xf32, #tpu.memory_space<smem>>
    %c0_1 = arith.constant 0 : index
    %c0_2 = arith.constant 0 : index
    %2 = vector.load %arg3[%c0_1, %c0_2] : memref<1x128xf32, #tpu.memory_space<vmem>>, vector<1x128xf32>
    %3 = vector.broadcast %0 : f32 to vector<1x128xf32>
    %4 = arith.mulf %2, %3 : vector<1x128xf32>
    %5 = vector.broadcast %1 : f32 to vector<1x128xf32>
    %6 = arith.addf %4, %5 : vector<1x128xf32>
    %c0_3 = arith.constant 0 : index
    %c0_4 = arith.constant 0 : index
    %7 = vector.load %arg4[%c0_3, %c0_4] : memref<1x128xf32, #tpu.memory_space<vmem>>, vector<1x128xf32>
    tpu.vector_store %arg4[%c0_3, %c0_4], %6 {strides = array<i32>} : memref<1x128xf32, #tpu.memory_space<vmem>>, vector<1x128xf32>,
    return
  }
  func.func @transform_0(%arg0: i32) -> i32 {
    %c0_i32 = arith.constant 0 : i32
    %c0_i32_0 = arith.constant 0 : i32
    return %c0_i32 : i32
  }
  func.func @transform_1(%arg0: i32) -> i32 {
    %c0_i32 = arith.constant 0 : i32
    %c0_i32_0 = arith.constant 0 : i32
    return %c0_i32 : i32
  }
  func.func @transform_2(%arg0: i32) -> (i32, i32) {
    %c0_i32 = arith.constant 0 : i32
    %c0_i32_0 = arith.constant 0 : i32
    %c0_i32_1 = arith.constant 0 : i32
    return %c0_i32, %c0_i32_0 : i32, i32
  }
  func.func @transform_3(%arg0: i32) -> (i32, i32) {
    %c0_i32 = arith.constant 0 : i32
    %c0_i32_0 = arith.constant 0 : i32
    %c0_i32_1 = arith.constant 0 : i32
    return %c0_i32, %c0_i32_0 : i32, i32
  }
}

</mosaic_0001>

<bundles_post_ra>
// kernel: tpu_custom_call.1
= control target key start
LH: loop header
LB: loop body
LE: loop exit
PB: predicated region body
PF: predicated region fallthrough
CT: control target
= control target key end

     0   :  { %s106_s0 = inlined_call_operand.<no memory space> [shape: f32[1], index: 0, kind: input, shape index: {}]   ;;  %s107_s1 = inlined_call_operand.<no memory space> [shape: f32[1], index: 1, kind: input, shape index: {}]   ;;  %s108_s2 = inlined_call_operand.vmem [shape: f32[1,128], index: 2, kind: input, shape index: {}]   ;;  %s109_s3 = inlined_call_operand.hbm [shape: f32[1,128], index: 3, kind: output, shape index: {}]  }
   0x1   :  { %v19_v0 = vld [vmem:[%s108_s2] sm:$0x1]  ;;  %v20_v1 = vstv %s106_s0  ;;  %v22_v2 = vstv %s107_s1 }
   0x2   :  { %10 = vsyncpa [#allocation5], 0  ;;  %v21_v3 = vmul.f32 %v20_v1, %v19_v0  ;;  %s64_s18 = smov [#allocation4]  }
   0x3   :  { %s31_s19 = sshll.u32 %s64_s18, 4  ;;  %s32_s19 = int_to_ptr.vmem [resolvable:$true] %s31_s19 }
   0x4   :  { %v23_v4 = vadd.f32 %v22_v2, %v21_v3  ;;  %s40_s20 = scalar_lea.vmem %s32_s19, 16  ;;  %s44_s21 = scalar_lea.vmem %s32_s19, 32 }
   0x5   :  { %p41_p0 = scmp.ne.s32.totalorder %s32_s19, %s40_s20  ;;  %p45_p1 = scmp.lt.s32.totalorder %s32_s19, %s32_s19 }
   0x6   :  { %24 = vst [vmem:[#allocation4] sm:$0x1] %v23_v4  ;;  %p46_p2 = scmp.lt.s32.totalorder %s44_s21, %s40_s20 }
   0x8   :  { %p47_p3 = por %p46_p2, %p45_p1 }
   0xa   :  { %p48_p4 = pnand %p47_p3, %p41_p0 }
   0xc   :  { %51 = shalt.err (!%p48_p4)
}
   0xd   :  { %s52_s22 = scalar_lea.hbm %s109_s3, 16 }
   0xe   :  { %p53_p5 = scmp.ne.s32.totalorder %s109_s3, %s52_s22  ;;  %p56_p6 = scmp.lt.u32.totalorder %s52_s22, %s109_s3 }
  0x10   :  { %p58_p7 = pnand %p56_p6, %p53_p5 }
  0x12   :  { %61 = shalt.err (!%p58_p7)
}
  0x13   :  { %34 = dma.vmem_to_hbm [thread:$0]  %s32_s19, 16, %s109_s3, [#allocation5]  }
  0x14   :  { %62 = dma.done.wait [#allocation5], 16  }
  0x15   :  { %63 = vsyncadd [#allocation5], 4294967280 }
  0x16   :  { %38 = vsyncpa [#allocation5], 1 }

</bundles_post_ra>
